<compile_context>
chip_gen: v5e
topology: v5e:2x2
jax: 0.10.0
libtpu: 0.0.40
codegen_flags: <defaults>
</compile_context>

<pallas_src>
import numpy as np
import jax
import jax.numpy as jnp
from jax.experimental import pallas as pl
from jax.experimental.pallas import tpu as pltpu

# ---- deterministic parameter setup (mirrors GradOp.__init__ + normalized_kernel;
#      default learnable=False => weights are fixed compile-time constants)
_BASE = np.array([[-3.0, -10.0, -3.0],
                  [0.0,   0.0,  0.0],
                  [3.0,  10.0,  3.0]], dtype=np.float32)
_NORM = float(np.abs(_BASE).sum())            # == 32.0
_K = _BASE / _NORM                            # normalized 3x3 kernel
_W_FILTERS = np.stack([_K, _K.T], axis=0)     # cat([kernel, kernel.mT], 0) -> (2,3,3)
# Separable form:  _K == outer([-1, 0, 1], [3, 10, 3]) / 32
_C3 = float(3.0 / _NORM)                      # 0.09375
_C10 = float(10.0 / _NORM)                    # 0.3125


def _gradop_kernel(mp_ref, o_ref):
    # mp_ref: (1, H+2, W+2) replicate-padded channel mean (f32, VMEM)
    # o_ref : (1, 2, H, W) output block
    H = o_ref.shape[2]
    W = o_ref.shape[3]
    mp = mp_ref[0]                                                          # (H+2, W+2)

    # Horizontal 3-tap smooth (coefficients already carry the 1/32 norm).
    sh = _C3 * mp[:, 0:W] + _C10 * mp[:, 1:W + 1] + _C3 * mp[:, 2:W + 2]    # (H+2, W)
    # Vertical 3-tap smooth.
    sv = _C3 * mp[0:H, :] + _C10 * mp[1:H + 1, :] + _C3 * mp[2:H + 2, :]    # (H, W+2)

    # filter 0 = base/32    -> vertical 2-tap difference of the horizontal smooth
    g0 = sh[2:H + 2, :] - sh[0:H, :]                                        # (H, W)
    # filter 1 = base.T/32  -> horizontal 2-tap difference of the vertical smooth
    g1 = sv[:, 2:W + 2] - sv[:, 0:W]                                        # (H, W)

    o_ref[0, 0] = g0.astype(o_ref.dtype)
    o_ref[0, 1] = g1.astype(o_ref.dtype)


def grad_op(x):
    """Pallas implementation of GradOp.forward. x: (N, C, H, W) -> (N, 2, H, W)."""
    N, C, H, W = x.shape
    # Channel mean + replicate pad as one fused XLA pass (review option (a)):
    # reads x exactly once and writes only the small (N, H+2, W+2) f32 plane,
    # instead of materializing and re-reading a padded NCHW copy.
    xm = jnp.mean(x.astype(jnp.float32), axis=1)                # (N, H, W)
    xp = jnp.pad(xm, ((0, 0), (1, 1), (1, 1)), mode="edge")     # (N, H+2, W+2)

    return pl.pallas_call(
        _gradop_kernel,
        out_shape=jax.ShapeDtypeStruct((N, 2, H, W), x.dtype),
        grid=(N,),
        in_specs=[pl.BlockSpec((1, H + 2, W + 2), lambda n: (n, 0, 0))],
        out_specs=pl.BlockSpec((1, 2, H, W), lambda n: (n, 0, 0, 0)),
        compiler_params=pltpu.CompilerParams(
            dimension_semantics=("parallel",)),
    )(xp)


def grad_op_ref(x):
    """Pure-JAX reference with literal mean -> pad -> 3x3 tap semantics."""
    N, C, H, W = x.shape
    xm = jnp.mean(x, axis=1)                                    # (N, H, W)
    xp = jnp.pad(xm, ((0, 0), (1, 1), (1, 1)), mode="edge")     # (N, H+2, W+2)
    outs = []
    for f in range(2):
        acc = jnp.zeros((N, H, W), dtype=jnp.float32)
        for p in range(3):
            for q in range(3):
                acc = acc + float(_W_FILTERS[f, p, q]) * xp[:, p:p + H, q:q + W]
        outs.append(acc)
    return jnp.stack(outs, axis=1).astype(x.dtype)              # (N, 2, H, W)


if __name__ == "__main__":
    key = jax.random.PRNGKey(0)
    x = jax.random.normal(key, (2, 4, 16, 16), dtype=jnp.float32)

    out = jax.block_until_ready(jax.jit(grad_op)(x))
    ref = jax.block_until_ready(grad_op_ref(x))

    assert out.shape == (2, 2, 16, 16), out.shape
    np.testing.assert_allclose(np.asarray(out), np.asarray(ref), rtol=1e-5, atol=1e-5)

    print("KERNEL_OK")
</pallas_src>

<mosaic_0001>
module attributes {stable_mosaic.version = 11 : i64} {
  func.func @_gradop_kernel(%arg0: i32, %arg1: memref<1x18x18xf32, #tpu.memory_space<vmem>>, %arg2: memref<1x2x16x16xf32, #tpu.memory_space<vmem>>) attributes {dimension_semantics = [#tpu.dimension_semantics<parallel>], iteration_bounds = array<i64: 2>, scalar_prefetch = 0 : i64, scratch_operands = 0 : i64, tpu.core_type = #tpu.core_type<tc>, window_params = [{transform_indices = @transform_0, window_bounds = array<i64: 1, 18, 18>}, {transform_indices = @transform_1, window_bounds = array<i64: 1, 2, 16, 16>}]} {
    %c0 = arith.constant 0 : index
    %c0_0 = arith.constant 0 : index
    %c0_1 = arith.constant 0 : index
    %0 = vector.load %arg1[%c0, %c0_0, %c0_1] : memref<1x18x18xf32, #tpu.memory_space<vmem>>, vector<1x18x18xf32>
    %1 = vector.shape_cast %0 : vector<1x18x18xf32> to vector<18x18xf32>
    %2 = vector.extract_strided_slice %1 {offsets = [0, 0], sizes = [18, 16], strides = [1, 1]} : vector<18x18xf32> to vector<18x16xf32>
    %cst = arith.constant 9.375000e-02 : f32
    %3 = vector.broadcast %cst : f32 to vector<18x16xf32>
    %4 = arith.mulf %3, %2 : vector<18x16xf32>
    %5 = vector.extract_strided_slice %1 {offsets = [0, 1], sizes = [18, 16], strides = [1, 1]} : vector<18x18xf32> to vector<18x16xf32>
    %cst_2 = arith.constant 3.125000e-01 : f32
    %6 = vector.broadcast %cst_2 : f32 to vector<18x16xf32>
    %7 = arith.mulf %6, %5 : vector<18x16xf32>
    %8 = arith.addf %4, %7 : vector<18x16xf32>
    %9 = vector.extract_strided_slice %1 {offsets = [0, 2], sizes = [18, 16], strides = [1, 1]} : vector<18x18xf32> to vector<18x16xf32>
    %cst_3 = arith.constant 9.375000e-02 : f32
    %10 = vector.broadcast %cst_3 : f32 to vector<18x16xf32>
    %11 = arith.mulf %10, %9 : vector<18x16xf32>
    %12 = arith.addf %8, %11 : vector<18x16xf32>
    %13 = vector.extract_strided_slice %1 {offsets = [0, 0], sizes = [16, 18], strides = [1, 1]} : vector<18x18xf32> to vector<16x18xf32>
    %cst_4 = arith.constant 9.375000e-02 : f32
    %14 = vector.broadcast %cst_4 : f32 to vector<16x18xf32>
    %15 = arith.mulf %14, %13 : vector<16x18xf32>
    %16 = vector.extract_strided_slice %1 {offsets = [1, 0], sizes = [16, 18], strides = [1, 1]} : vector<18x18xf32> to vector<16x18xf32>
    %cst_5 = arith.constant 3.125000e-01 : f32
    %17 = vector.broadcast %cst_5 : f32 to vector<16x18xf32>
    %18 = arith.mulf %17, %16 : vector<16x18xf32>
    %19 = arith.addf %15, %18 : vector<16x18xf32>
    %20 = vector.extract_strided_slice %1 {offsets = [2, 0], sizes = [16, 18], strides = [1, 1]} : vector<18x18xf32> to vector<16x18xf32>
    %cst_6 = arith.constant 9.375000e-02 : f32
    %21 = vector.broadcast %cst_6 : f32 to vector<16x18xf32>
    %22 = arith.mulf %21, %20 : vector<16x18xf32>
    %23 = arith.addf %19, %22 : vector<16x18xf32>
    %24 = vector.extract_strided_slice %12 {offsets = [2, 0], sizes = [16, 16], strides = [1, 1]} : vector<18x16xf32> to vector<16x16xf32>
    %25 = vector.extract_strided_slice %12 {offsets = [0, 0], sizes = [16, 16], strides = [1, 1]} : vector<18x16xf32> to vector<16x16xf32>
    %26 = arith.subf %24, %25 : vector<16x16xf32>
    %27 = vector.extract_strided_slice %23 {offsets = [0, 2], sizes = [16, 16], strides = [1, 1]} : vector<16x18xf32> to vector<16x16xf32>
    %28 = vector.extract_strided_slice %23 {offsets = [0, 0], sizes = [16, 16], strides = [1, 1]} : vector<16x18xf32> to vector<16x16xf32>
    %29 = arith.subf %27, %28 : vector<16x16xf32>
    %c0_7 = arith.constant 0 : index
    %c0_8 = arith.constant 0 : index
    %c0_9 = arith.constant 0 : index
    %c0_10 = arith.constant 0 : index
    %30 = vector.load %arg2[%c0_7, %c0_8, %c0_9, %c0_10] : memref<1x2x16x16xf32, #tpu.memory_space<vmem>>, vector<1x1x16x16xf32>
    %31 = vector.shape_cast %30 : vector<1x1x16x16xf32> to vector<16x16xf32>
    %32 = vector.shape_cast %26 : vector<16x16xf32> to vector<1x1x16x16xf32>
    tpu.vector_store %arg2[%c0_7, %c0_8, %c0_9, %c0_10], %32 {strides = array<i32>} : memref<1x2x16x16xf32, #tpu.memory_space<vmem>>, vector<1x1x16x16xf32>,
    %c0_11 = arith.constant 0 : index
    %c1 = arith.constant 1 : index
    %c0_12 = arith.constant 0 : index
    %c0_13 = arith.constant 0 : index
    %33 = vector.load %arg2[%c0_11, %c1, %c0_12, %c0_13] : memref<1x2x16x16xf32, #tpu.memory_space<vmem>>, vector<1x1x16x16xf32>
    %34 = vector.shape_cast %33 : vector<1x1x16x16xf32> to vector<16x16xf32>
    %35 = vector.shape_cast %29 : vector<16x16xf32> to vector<1x1x16x16xf32>
    tpu.vector_store %arg2[%c0_11, %c1, %c0_12, %c0_13], %35 {strides = array<i32>} : memref<1x2x16x16xf32, #tpu.memory_space<vmem>>, vector<1x1x16x16xf32>,
    return
  }
  func.func @transform_0(%arg0: i32) -> (i32, i32, i32) {
    %c0_i32 = arith.constant 0 : i32
    %c0_i32_0 = arith.constant 0 : i32
    %c0_i32_1 = arith.constant 0 : i32
    return %arg0, %c0_i32, %c0_i32_0 : i32, i32, i32
  }
  func.func @transform_1(%arg0: i32) -> (i32, i32, i32, i32) {
    %c0_i32 = arith.constant 0 : i32
    %c0_i32_0 = arith.constant 0 : i32
    %c0_i32_1 = arith.constant 0 : i32
    %c0_i32_2 = arith.constant 0 : i32
    return %arg0, %c0_i32, %c0_i32_0, %c0_i32_1 : i32, i32, i32, i32
  }
}

</mosaic_0001>

<bundles_post_ra>
// kernel: grad_op.1
= control target key start
LH: loop header
LB: loop body
LE: loop exit
PB: predicated region body
PF: predicated region fallthrough
CT: control target
= control target key end

     0   :  { %6 = vsyncpa [#allocation3], 0  ;;  %s522_s0 = inlined_call_operand.vmem [shape: f32[2,18,18], index: 0, kind: input, shape index: {}]   ;;  %s523_s1 = inlined_call_operand.hbm [shape: f32[2,2,16,16], index: 1, kind: output, shape index: {}]  }
   0x1   :  { %8 = vsyncpa [#allocation3 + $0x1], 0  ;;  %s429_s6 = smov 0   ;;  %s431_s7 = smov 0  }
   0x2   :  { %s433_s8 = smov 0   ;;  %s435_s9 = smov 0  }
   0x3 LB: > { %s450_s10 = sadd.s32 4294967295, %s412_s9   ;;  %s291_s11 = sadd.s32 4294967294, %s412_s9   ;;  %s412_s9 = sphi %s435_s9, %s529_s9   ;;  %s408_s8 = sphi %s433_s8, %s528_s8   ;;  %s404_s7 = sphi %s431_s7, %s527_s7   ;;  %s400_s6 = sphi %s429_s6, %s526_s6  }
   0x4   : > { %s454_s12 = sadd.s32 1, %s412_s9   ;;  %s47_s13 = sadd.s32 1, %s408_s8 }
   0x5   : > { %s44_s14 = ssub.s32 %s412_s9, %s454_s12  ;;  %p57_p0 = scmp.ne.s32.totalorder %s408_s8, %s404_s7 }
   0x6   : > { %p45_p1 = scmp.eq.s32.totalorder %s44_s14, 0  ;;  %p58_p2 = scmp.eq.s32.totalorder %s450_s10, 1 }
   0x7   : > { %p63_p3 = scmp.ne.s32.totalorder %s404_s7, %s400_s6  ;;  %p64_p4 = scmp.eq.s32.totalorder %s291_s11, 1 }
   0x8   : > { %s465_s15 = scalar_select %p45_p1, %s408_s8, %s47_s13  }
   0x9   : > { %p467_p5 = por %p58_p2, %p57_p0  ;;  %p471_p6 = por %p64_p4, %p63_p3 }
   0xa   : > { %p294_p7 = scmp.ge.s32.totalorder %s412_s9, 1  ;;  %p90_p8 = scmp.lt.s32.totalorder %s412_s9, 3 }
   0xc   : > { %p91_p9 = pnand %p294_p7, %p90_p8 }
   0xd   : > { %p110_p10 = scmp.lt.s32.totalorder (!%p91_p9), %s450_s10, 1  ;;  %s414_s23 = smov (!%p91_p9), 127  }
   0xe   : > { %94 = sbr.rel (%p91_p9) target bundleno = 278 (0x116), region = 24  ;;  %s415_s24 = smov (!%p91_p9), 126  }
   0xf   : > { %s416_s25 = smov (!%p91_p9), 2   ;;  %s107_s26 = sand.u32 (!%p91_p9), 1, %s404_s7  }
  0x10   : > { %s295_s27 = sshll.u32 (!%p91_p9), %s107_s26, 5  ;;  %s304_s29 = sshll.u32 (!%p91_p9), %s450_s10, 5 }
  0x11   : > { %s109_s28 = scalar_lea.vmem (!%p91_p9), [#allocation2], %s295_s27  ;;  %s225_s3 = scalar_lea.hbm (!%p91_p9), %s523_s1, %s304_s29 }
  0x12   : > { %s226_s4 = sshll.u32 (!%p91_p9), %s109_s28, 4  ;;  %s228_s5 = sshll.u32 (!%p91_p9), %s225_s3, 4  ;;  %s227_s4 = int_to_ptr.vmem [resolvable:$true] %s226_s4  ;;  %s229_s5 = int_to_ptr.hbm [resolvable:$true] %s228_s5 }
  0x13   : > { %s111_s18 = scalar_select %p110_p10, %s450_s10, 1  ;;  %vm154_vm0 = vcmask 1046528   ;;  %vm164_vm1 = vcmask 1045504   ;;  %vm196_vm2 = vcmask 130050   ;;  %vm176_vm3 = vcmask 1041408  }
  0x14   : > { %vm198_vm4 = vcmask 130048   ;;  %vm200_vm5 = vcmask 123904   ;;  %s214_s11 = scalar_lea.sflag [#allocation3], %s107_s26  ;;  %s364_s13 = sshra.s32 %s229_s5, 4  ;;  %s365_s13 = int_to_ptr.hbm [resolvable:$true] %s364_s13 }
  0x15   : > { %s305_s19 = smul.u32 24, %s111_s18  ;;  %s366_s14 = scalar_lea.hbm %s365_s13, 32 }
  0x16   : > { %p367_p11 = scmp.ne.s32.totalorder %s365_s13, %s366_s14  ;;  %p371_p0 = scmp.lt.s32.totalorder %s365_s13, %s523_s1 }
  0x17   : > { %s114_s22 = scalar_lea.vmem %s522_s0, %s305_s19  ;;  %s370_s19 = scalar_lea.hbm %s523_s1, 64 }
  0x18   : > { %v115_v0 = vld [vmem:[%s114_s22] sm:$0xff]  ;;  %v116_v1 = vld [vmem:[%s114_s22 + $0x8] sm:$0xff]  ;;  %v117_v2 = vld [vmem:[%s114_s22 + $0x10] sm:$0x3]  ;;  %p368_p12 = pnand %p367_p11, %p467_p5  ;;  %p372_p1 = scmp.lt.s32.totalorder %s370_s19, %s366_s14 }
  0x19   : > { %v118_v3 = vmul.f32 0.09375, %v115_v0  ;;  %v119_v4 = vmul.f32 0.09375, %v116_v1  ;;  %v121_v5 = vmul.f32 0.3125, %v115_v0  ;;  %v122_v6 = vmul.f32 0.3125, %v116_v1 }
  0x1a   : > { %v120_v7 = vmul.f32 0.09375, %v117_v2  ;;  %v123_v8 = vmul.f32 0.3125, %v117_v2  ;;  %p369_p13 = pneg %p368_p12  ;;  %p373_p2 = por %p372_p1, %p371_p0 }
  0x1b   : > { %v155_v9 = vrot.slane %v121_v5, 1  ;;  %v156_v10 = vrot.slane %v122_v6, 1  ;;  %v165_v11 = vrot.slane %v118_v3, 2  ;;  %v166_v12 = vrot.slane %v119_v4, 2  ;;  %127 = vrot.lane.b32.xlu1 %v121_v5, %s414_s23  ;;  %142 = vrot.lane.b32.xlu2 %v118_v3, %s415_s24 }
  0x1c   : > { %v158_v13 = vrot.slane %v123_v8, 1  ;;  %v168_v18 = vrot.slane %v120_v7, 2  ;;  %p374_p3 = pnand %p373_p2, %p369_p13 }
  0x1d   : > { %v157_v14 = vsel %vm154_vm0, %v155_v9, %v156_v10  ;;  %v167_v15 = vsel %vm164_vm1, %v165_v11, %v166_v12 }
  0x1e   : > { %v162_v16 = vadd.f32 %v157_v14, %v118_v3  ;;  %v159_v17 = vsel %vm154_vm0, %v156_v10, %v158_v13  ;;  %v169_v21 = vsel %vm164_vm1, %v166_v12, %v168_v18 }
  0x1f   : > { %v163_v20 = vadd.f32 %v159_v17, %v119_v4 }
  0x20   : > { %v172_v19 = vadd.f32 %v167_v15, %v162_v16 }
  0x21   : > { %v173_v22 = vadd.f32 %v169_v21, %v163_v20 }
  0x22   : > { %188 = vrot.lane.b32.xlu0 %v172_v19, %s416_s25 }
  0x23   : > { %129 = vrot.lane.b32.xlu1 %v122_v6, %s414_s23  ;;  %144 = vrot.lane.b32.xlu2 %v119_v4, %s415_s24 }
  0x2a   : > { %190 = vrot.lane.b32.xlu0 %v173_v22, %s416_s25 }
  0x2b   : > { %146 = vrot.lane.b32.xlu1 %v120_v7, %s415_s24 }
  0x32   : > { %131 = vrot.lane.b32.xlu0 %v123_v8, %s414_s23 }
  0x75   : > { %v143_v27 = vpop.permute.xlu2 %142 }
  0x7d   : > { %v145_v35 = vpop.permute.xlu2 %144 }
  0x8d   : > { %v128_v28 = vpop.permute.xlu1 %127 }
  0x8e   : > { %v136_v29 = vadd.f32 %v128_v28, %v118_v3 }
  0x90   : > { %v151_v30 = vadd.f32 %v143_v27, %v136_v29 }
  0x92   : > { %v177_v31 = vrot.slane %v151_v30, 6 }
  0x94   : > { %v189_v23 = vpop.permute.xlu0 %188  ;;  %v183_v32 = vsub.f32 %v151_v30, %v177_v31 }
  0x95   : > { %v194_v24 = vsub.f32 %v172_v19, %v189_v23  ;;  %v130_v33 = vpop.permute.xlu1 %129 }
  0x96   : > { %197 = vst.msk [vmem:[%s109_s28 - $0x2] sm:$0xfc] %vm196_vm2, %v183_v32  ;;  %v137_v34 = vadd.f32 %v130_v33, %v119_v4 }
  0x97   : > { %204 = vrot.lane.b32.xlu2 %v194_v24, %s415_s24 }
  0x98   : > { %v152_v37 = vadd.f32 %v145_v35, %v137_v34 }
  0x9a   : > { %v178_v38 = vrot.slane %v152_v37, 6 }
  0x9c   : > { %v191_v25 = vpop.permute.xlu0 %190  ;;  %v179_v40 = vsel %vm176_vm3, %v177_v31, %v178_v38 }
  0x9d   : > { %v195_v26 = vsub.f32 %v173_v22, %v191_v25  ;;  %v184_v41 = vsub.f32 %v152_v37, %v179_v40  ;;  %v147_v42 = vpop.permute.xlu1 %146 }
  0x9f   : > { %206 = vrot.lane.b32.xlu0 %v195_v26, %s415_s24  ;;  %199 = vst.msk [vmem:[%s109_s28 + $0x6] sm:$0xff] %vm198_vm4, %v184_v41 }
  0xa4   : > { %v132_v36 = vpop.permute.xlu0 %131 }
  0xa5   : > { %v138_v39 = vadd.f32 %v132_v36, %v120_v7 }
  0xa7   : > { %v153_v43 = vadd.f32 %v147_v42, %v138_v39 }
  0xa9   : > { %v185_v44 = vsub.f32 %v153_v43, %v178_v38 }
  0xab   : > { %201 = vst.msk [vmem:[%s109_s28 + $0xe] sm:$0x3] %vm200_vm5, %v185_v44 }
  0xf1   : > { %v205_v45 = vpop.permute.xlu2 %204 }
  0xf2   : > { %297 = vst.msk [vmem:[%s109_s28 + $0x10] sm:$0xff] %vm198_vm4, %v205_v45 }
 0x111   : > { %v207_v46 = vpop.permute.xlu0 %206 }
 0x112   : > { %298 = vst.msk [vmem:[%s109_s28 + $0x18] sm:$0xff] %vm198_vm4, %v207_v46 }
 0x113   : > { %377 = shalt.err (!%p374_p3)
}
 0x114   : > { %s417_s22 = smov 128   ;;  %s418_s23 = smov 8  }
 0x115   : > { %306 = dma.vmem_to_hbm [thread:$0]  (%p467_p5), %s227_s4, 512, %s229_s5, %s214_s11, %s417_s22, %s417_s22, %s418_s23  }
 0x116 PF: > { %p312_p4 = scmp.ge.s32.totalorder %s412_s9, 2  ;;  %s243_s24 = sand.u32 1, %s400_s6  }
 0x117   : > { %s244_s25 = scalar_lea.sflag [#allocation3], %s243_s24 }
 0x118   : > { %p309_p7 = pnand %p312_p4, %p471_p6 }
 0x11a   : > { %p310_p8 = pneg %p309_p7 }
 0x11c   : > { %395 = dma.done.wait (%p310_p8), %s244_s25, 512  }
 0x11d   : > { %397 = vsyncadd (%p310_p8), %s244_s25, 4294966784  ;;  %p11_p9 = scmp.ge.s32.totalorder %s454_s12, 4   ;;  %s526_s6 = smov %s404_s7 }
 0x11e   : > { %s527_s7 = smov %s408_s8  ;;  %s528_s8 = smov %s465_s15 }
 0x11f   : > { %s529_s9 = smov %s454_s12  ;;  %13 = sbr.rel (!%p11_p9) target bundleno = 3 (0x3), region = 60 }
 0x124   :  { %250 = vsyncpa [#allocation3], 1 }
 0x125   :  { %252 = vsyncpa [#allocation3 + $0x1], 1 }

</bundles_post_ra>
